<compile_context>
chip_gen: v7x
topology: tpu7x:2x2x1
jax: 0.10.0
libtpu: 0.0.40
codegen_flags: <defaults>
</compile_context>

<pallas_src>
import math

import numpy as np
import jax
import jax.numpy as jnp
from jax.experimental import pallas as pl
from jax.experimental.pallas import tpu as pltpu

# ----------------------------- small synthetic config -----------------------------
SAMPLING_RATE = 16000
WINDOW_SIZE = 64            # n_fft
HOP_LENGTH = 32
NUM_MEL_BINS = 16
D_MODEL = 32
NUM_HEADS = 4
HEAD_DIM = D_MODEL // NUM_HEADS
FFN_DIM = 4 * D_MODEL
NUM_LAYERS = 2
MAX_SOURCE_POSITIONS = 8
CONV1_STRIDE = 1
CONV2_STRIDE = 2
DOWNSAMPLE = CONV1_STRIDE * CONV2_STRIDE
CHUNK_SIZE = MAX_SOURCE_POSITIONS * DOWNSAMPLE     # mel frames per chunk (16)
NUM_FREQ_BINS = 1 + WINDOW_SIZE // 2
LN_EPS = 1e-5
DTYPE = jnp.float32
WEIGHT_DTYPE = jnp.bfloat16                        # matmul operand dtype (f32 accumulate)

B_BLK = 8                                          # audio chunks processed per grid step


# ----------------------------- Pallas kernels --------------------------------------
def _mel_log_kernel(mag_ref, filt_ref, o_ref):
    # log-mel: (T, F) @ (F, M) -> clamp -> log10 -> dynamic range (per-AUDIO max) -> norm
    mel = jnp.dot(mag_ref[0], filt_ref[...], preferred_element_type=jnp.float32)
    log_spec = jnp.log10(jnp.maximum(mel, 1e-10))
    gmax = jnp.max(log_spec)                 # one audio per grid step -> per-audio max
    log_spec = jnp.maximum(log_spec, gmax - 8.0)
    o_ref[0] = ((log_spec + 4.0) / 4.0).astype(o_ref.dtype)


def _fused_encoder_kernel(
    x_ref, pos_ref, mask_ref, sel2_ref, c1w_ref, c1b_ref, c2w_ref, c2b_ref,
    ln1g_ref, ln1b_ref, qw_ref, qb_ref, kw_ref, vw_ref, vb_ref, ow_ref, ob_ref,
    ln2g_ref, ln2b_ref, fc1w_ref, fc1b_ref, fc2w_ref, fc2b_ref,
    lnfg_ref, lnfb_ref,
    o_ref,
    x_scratch,
):
    """Grid = (chunk_block, layer).  One step = one transformer layer applied to
    B_BLK chunks whose tokens are flattened as rows (position-major: row = s*B+b).
    Layer weights stream along the inner axis; the hidden state persists in VMEM
    scratch.  Conv front-end runs at layer 0, final LN + store at the last layer."""
    f32, bf16 = jnp.float32, jnp.bfloat16
    B, S, D = B_BLK, MAX_SOURCE_POSITIONS, D_MODEL
    l = pl.program_id(1)

    def gelu(y):                 # exact (erf) GELU, matches torch default
        return 0.5 * y * (1.0 + jax.lax.erf(y * (1.0 / math.sqrt(2.0))))

    def layer_norm(y, g, b):
        mu = jnp.mean(y, axis=-1, keepdims=True)
        yc = y - mu
        var = jnp.mean(yc * yc, axis=-1, keepdims=True)
        return yc * jax.lax.rsqrt(var + LN_EPS) * g + b

    # ---------------- conv front-end (first layer step only) ----------------
    @pl.when(l == 0)
    def _():
        # conv1 (k=3, s=1, p=1): im2col done once in the wrapper -> one matmul.
        h1 = gelu(jnp.dot(x_ref[...], c1w_ref[...], preferred_element_type=f32)
                  + c1b_ref[...])                                        # (B*T, D)
        h1b = h1.astype(bf16)
        # conv2 (k=3, s=2, p=1): constant 0/1 gather matrices, resident in VMEM.
        acc2 = jnp.dot(
            jnp.dot(sel2_ref[0], h1b, preferred_element_type=f32).astype(bf16),
            c2w_ref[0], preferred_element_type=f32)
        for k in (1, 2):
            tap = jnp.dot(sel2_ref[k], h1b, preferred_element_type=f32)
            acc2 = acc2 + jnp.dot(tap.astype(bf16), c2w_ref[k],
                                  preferred_element_type=f32)
        x_scratch[...] = gelu(acc2 + c2b_ref[...]) + pos_ref[...]        # (B*S, D)

    # ---------------- one transformer layer (pre-LN) ----------------
    x = x_scratch[...]                                                   # f32 residual stream

    # --- self attention: per-head weights were split at init (no activation lane
    #     slicing); all chunks share one (B*S, B*S) score matrix with a constant
    #     block-diagonal additive mask so chunks never attend across each other.
    h = layer_norm(x, ln1g_ref[0], ln1b_ref[0])
    hb = h.astype(bf16)
    mask = mask_ref[...]
    attn = None
    for hd in range(NUM_HEADS):
        q = jnp.dot(hb, qw_ref[0, hd], preferred_element_type=f32) + qb_ref[0, hd]
        k = jnp.dot(hb, kw_ref[0, hd], preferred_element_type=f32)      # k_proj: no bias
        v = jnp.dot(hb, vw_ref[0, hd], preferred_element_type=f32) + vb_ref[0, hd]
        # contract dim 1 of both operands -> no explicit k transpose.
        s = jax.lax.dot_general(q.astype(bf16), k.astype(bf16),
                                (((1,), (1,)), ((), ())),
                                preferred_element_type=f32)              # (B*S, B*S)
        s = s + mask
        s = s - jnp.max(s, axis=-1, keepdims=True)
        p = jnp.exp(s)
        p = p * pl.reciprocal(jnp.sum(p, axis=-1, keepdims=True), approx=True)
        o = jnp.dot(p.astype(bf16), v.astype(bf16), preferred_element_type=f32)
        contrib = jnp.dot(o.astype(bf16), ow_ref[0, hd], preferred_element_type=f32)
        attn = contrib if attn is None else attn + contrib
    x = x + attn + ob_ref[0]

    # --- MLP: fc1 + GELU + fc2 + residual ---
    h = layer_norm(x, ln2g_ref[0], ln2b_ref[0])
    ff = gelu(jnp.dot(h.astype(bf16), fc1w_ref[0], preferred_element_type=f32)
              + fc1b_ref[0])
    x = x + jnp.dot(ff.astype(bf16), fc2w_ref[0], preferred_element_type=f32) + fc2b_ref[0]
    x_scratch[...] = x

    # ---------------- final LayerNorm + lane-dense store (last layer step) ----------------
    @pl.when(l == NUM_LAYERS - 1)
    def _():
        y = layer_norm(x, lnfg_ref[...], lnfb_ref[...])                  # rows = (s, b)
        # One (B_BLK, S*D) = (8, 256) block: contiguous sublane slices + lane
        # concat -> unmasked 256-lane stores (no relayout reshape needed).
        o_ref[...] = jnp.concatenate(
            [y[s * B:(s + 1) * B, :] for s in range(S)], axis=-1).astype(o_ref.dtype)


# ----------------------------- kernel wrappers --------------------------------------
def pallas_mel_log(mag_stack, filt):
    # mag_stack: (n_audio, T_max, F) zero-padded power spectrograms; filt: (F, M)
    A, T, F = mag_stack.shape
    M = filt.shape[1]
    return pl.pallas_call(
        _mel_log_kernel,
        out_shape=jax.ShapeDtypeStruct((A, T, M), jnp.float32),
        grid=(A,),
        in_specs=[pl.BlockSpec((1, T, F), lambda a: (a, 0, 0)),
                  pl.BlockSpec((F, M), lambda a: (0, 0))],
        out_specs=pl.BlockSpec((1, T, M), lambda a: (a, 0, 0)),
        compiler_params=pltpu.CompilerParams(dimension_semantics=("parallel",)),
    )(mag_stack, filt)


def pallas_whisper_encoder(kp, x2d, n_blocks):
    """x2d: (n_blocks * CHUNK_SIZE * B_BLK, 3*NUM_MEL_BINS) bf16 im2col rows,
    ordered per block as (time, chunk)."""
    S, D = MAX_SOURCE_POSITIONS, D_MODEL
    N_T = B_BLK * CHUNK_SIZE
    N_S = B_BLK * S

    def const_spec(a):
        nd = a.ndim
        return pl.BlockSpec(a.shape, lambda i, l, _nd=nd: (0,) * _nd)

    def layer_spec(a):
        nd = a.ndim
        return pl.BlockSpec((1,) + a.shape[1:],
                            lambda i, l, _nd=nd: (l,) + (0,) * (_nd - 1))

    const_names = ["pos", "mask", "sel2", "c1w", "c1b", "c2w", "c2b"]
    layer_names = ["ln1_g", "ln1_b", "q_w", "q_b", "k_w", "v_w", "v_b", "o_w", "o_b",
                   "ln2_g", "ln2_b", "fc1_w", "fc1_b", "fc2_w", "fc2_b"]
    final_names = ["lnf_g", "lnf_b"]

    inputs = [x2d] + [kp[n] for n in const_names + layer_names + final_names]
    in_specs = ([pl.BlockSpec((N_T, 3 * NUM_MEL_BINS), lambda i, l: (i, 0))]
                + [const_spec(kp[n]) for n in const_names]
                + [layer_spec(kp[n]) for n in layer_names]
                + [const_spec(kp[n]) for n in final_names])

    return pl.pallas_call(
        _fused_encoder_kernel,
        out_shape=jax.ShapeDtypeStruct((n_blocks * B_BLK, S * D), DTYPE),
        grid=(n_blocks, NUM_LAYERS),
        in_specs=in_specs,
        out_specs=pl.BlockSpec((B_BLK, S * D), lambda i, l: (i, 0)),
        scratch_shapes=[pltpu.VMEM((N_S, D), jnp.float32)],
        compiler_params=pltpu.CompilerParams(
            # outer chunk-block axis is parallel (helps v7x's 2 TCs; harmless on
            # single-TC v5e/v6e), inner layer axis streams weights.
            dimension_semantics=("parallel", "arbitrary"),
            vmem_limit_bytes=32 * 1024 * 1024),
    )(*inputs)


# ----------------------------- model glue --------------------------------------
def mel_filter_bank(num_frequency_bins, num_mel_bins, min_frequency, max_frequency,
                    sampling_rate):
    # HTK-scale triangular filters (transformers' mel_filter_bank, norm=None, mel_scale="htk")
    def hz_to_mel(f):
        return 2595.0 * jnp.log10(1.0 + f / 700.0)

    def mel_to_hz(m):
        return 700.0 * (10.0 ** (m / 2595.0) - 1.0)

    fft_freqs = jnp.linspace(0.0, sampling_rate / 2.0, num_frequency_bins)
    mel_pts = jnp.linspace(hz_to_mel(jnp.float32(min_frequency)),
                           hz_to_mel(jnp.float32(max_frequency)),
                           num_mel_bins + 2)
    hz_pts = mel_to_hz(mel_pts)
    fdiff = jnp.diff(hz_pts)
    slopes = hz_pts[None, :] - fft_freqs[:, None]
    down = -slopes[:, :-2] / fdiff[:-1]
    up = slopes[:, 2:] / fdiff[1:]
    return jnp.maximum(0.0, jnp.minimum(down, up)).astype(jnp.float32)  # (n_freq, n_mel)


def compute_whisper_melspec_batched(audio_list, mel_filters):
    # torch.stft semantics: center=True, reflect pad, periodic hann, onesided, drop last frame.
    n_fft, hop = WINDOW_SIZE, HOP_LENGTH
    window = 0.5 * (1.0 - jnp.cos(2.0 * jnp.pi * jnp.arange(n_fft, dtype=jnp.float32) / n_fft))
    mags, n_frames_list = [], []
    for audio in audio_list:
        padded = jnp.pad(audio.astype(jnp.float32), (n_fft // 2, n_fft // 2), mode="reflect")
        n_frames = 1 + (padded.shape[0] - n_fft) // hop
        idx = jnp.arange(n_frames)[:, None] * hop + jnp.arange(n_fft)[None, :]
        frames = padded[idx] * window[None, :]
        # TODO(synk): rfft has no Pallas TPU primitive; STFT kept in plain-JAX glue.
        spec = jnp.fft.rfft(frames, axis=-1)
        mag = (jnp.abs(spec) ** 2)[:-1, :]                  # drop last frame, (T_i, F)
        mags.append(mag)
        n_frames_list.append(mag.shape[0])
    t_max = max(n_frames_list)
    # One batched pallas_call over all audios; zero-padded rows (log=-10) never
    # affect the per-audio dynamic-range max and are sliced off afterwards.
    mag_stack = jnp.stack([jnp.pad(m, ((0, t_max - m.shape[0]), (0, 0))) for m in mags])
    mel = pallas_mel_log(mag_stack, mel_filters)            # (n_audio, t_max, M)
    return [mel[i, :t] for i, t in enumerate(n_frames_list)]


def sinusoids(length, channels):
    log_ts = math.log(10000.0) / (channels // 2 - 1)
    inv = jnp.exp(-log_ts * jnp.arange(channels // 2, dtype=jnp.float32))
    scaled = jnp.arange(length, dtype=jnp.float32)[:, None] * inv[None, :]
    return jnp.concatenate([jnp.sin(scaled), jnp.cos(scaled)], axis=1)


def voxtral_encoder_forward(kernel_params, mel_filters, audio_list):
    # == VoxtralEncoderModel.forward(list[waveform]) ==
    feats = compute_whisper_melspec_batched(audio_list, mel_filters)     # list of (T_i, M)
    chunks, chunks_per_example = [], []
    for f in feats:
        T = f.shape[0]
        n = T // CHUNK_SIZE
        assert n * CHUNK_SIZE == T, "test audio must produce whole chunks"
        chunks.append(f.reshape(n, CHUNK_SIZE, NUM_MEL_BINS))
        chunks_per_example.append(n)
    x = jnp.concatenate(chunks, axis=0)                                  # (Bc, T, M)
    Bc = x.shape[0]

    # conv1 im2col: zero-pad time, stack the 3 taps along channels (layout plumbing).
    xp = jnp.pad(x, ((0, 0), (1, 1), (0, 0)))
    xim = jnp.concatenate([xp[:, k:k + CHUNK_SIZE, :] for k in range(3)], axis=-1)  # (Bc,T,3M)

    # Pad chunk count to whole B_BLK blocks; keep the block count even (>1) so the
    # parallel grid axis load-balances across v7x's two TensorCores.
    n_blocks = pl.cdiv(Bc, B_BLK)
    if n_blocks > 1 and n_blocks % 2 == 1:
        n_blocks += 1
    Bc_pad = n_blocks * B_BLK
    xim = jnp.pad(xim, ((0, Bc_pad - Bc), (0, 0), (0, 0)))

    # Per-block (time, chunk) row order -> lane-dense 2D slabs in the kernel.
    x2d = (xim.reshape(n_blocks, B_BLK, CHUNK_SIZE, 3 * NUM_MEL_BINS)
              .transpose(0, 2, 1, 3)
              .reshape(n_blocks * CHUNK_SIZE * B_BLK, 3 * NUM_MEL_BINS)
              .astype(WEIGHT_DTYPE))

    out = pallas_whisper_encoder(kernel_params, x2d, n_blocks)           # (Bc_pad, S*D)
    out = out[:Bc].reshape(Bc, MAX_SOURCE_POSITIONS, D_MODEL)

    results, idx = [], 0
    for n in chunks_per_example:
        results.append(out[idx:idx + n].reshape(n * MAX_SOURCE_POSITIONS, D_MODEL))
        idx += n
    return results


# ----------------------------- parameter init / kernel layout -----------------------------
def init_params(key):
    # torch-layout parameters (Linear weights are (out, in), conv weights (C_out, C_in, K))
    keys = jax.random.split(key, 64)
    it = iter(keys)

    def nrm(shape, scale=0.02):
        return scale * jax.random.normal(next(it), shape, dtype=jnp.float32)

    params = {
        "conv1_w": nrm((D_MODEL, NUM_MEL_BINS, 3)),
        "conv1_b": nrm((D_MODEL,)),
        "conv2_w": nrm((D_MODEL, D_MODEL, 3)),
        "conv2_b": nrm((D_MODEL,)),
        "ln_f_g": jnp.ones((D_MODEL,), jnp.float32),
        "ln_f_b": jnp.zeros((D_MODEL,), jnp.float32),
        "layers": [],
    }
    for _ in range(NUM_LAYERS):
        params["layers"].append({
            "ln1_g": jnp.ones((D_MODEL,), jnp.float32),
            "ln1_b": jnp.zeros((D_MODEL,), jnp.float32),
            "q_w": nrm((D_MODEL, D_MODEL)), "q_b": nrm((D_MODEL,)),
            "k_w": nrm((D_MODEL, D_MODEL)),            # Whisper k_proj has no bias
            "v_w": nrm((D_MODEL, D_MODEL)), "v_b": nrm((D_MODEL,)),
            "o_w": nrm((D_MODEL, D_MODEL)), "o_b": nrm((D_MODEL,)),
            "ln2_g": jnp.ones((D_MODEL,), jnp.float32),
            "ln2_b": jnp.zeros((D_MODEL,), jnp.float32),
            "fc1_w": nrm((FFN_DIM, D_MODEL)), "fc1_b": nrm((FFN_DIM,)),
            "fc2_w": nrm((D_MODEL, FFN_DIM)), "fc2_b": nrm((D_MODEL,)),
        })
    return params


def _conv2_gather_matrices():
    # Constant 0/1 matrices for the stride-2 conv2 gather in (position, chunk) row order.
    T, S, B = CHUNK_SIZE, MAX_SOURCE_POSITIONS, B_BLK
    sel = np.zeros((3, B * S, B * T), np.float32)
    for k in range(3):
        for s in range(S):
            t = 2 * s + k - 1
            if 0 <= t < T:
                for b in range(B):
                    sel[k, s * B + b, t * B + b] = 1.0
    return jnp.asarray(sel, dtype=WEIGHT_DTYPE)


def _chunk_block_mask():
    # Additive mask keeping attention within each chunk (rows/cols ordered s*B + b).
    n = B_BLK * MAX_SOURCE_POSITIONS
    idx = np.arange(n)
    same = (idx[:, None] % B_BLK) == (idx[None, :] % B_BLK)
    return jnp.asarray(np.where(same, 0.0, -1e9), dtype=jnp.float32)


def prepare_kernel_params(params):
    # One-time conversion to kernel layout: pre-transposed (in, out) matrices, per-head
    # weight splits, folded conv1 im2col weight, bf16 matmul weights, f32 biases/LN.
    H, Dh = NUM_HEADS, HEAD_DIM
    scale = HEAD_DIM ** -0.5      # attention scaling folded into q weights/bias
    wdt = WEIGHT_DTYPE

    def per_head_in_out(w_t):     # (D_in, D_out) -> (H, D_in, Dh) splitting output cols
        return jnp.transpose(w_t.reshape(D_MODEL, H, Dh), (1, 0, 2))

    def stack(fn):
        return jnp.stack([fn(l) for l in params["layers"]])

    kp = {
        "pos": jnp.repeat(sinusoids(MAX_SOURCE_POSITIONS, D_MODEL), B_BLK, axis=0),
        "mask": _chunk_block_mask(),
        "sel2": _conv2_gather_matrices(),
        # conv1: (K, C_in, C_out) flattened to (K*C_in, D) matching the wrapper's im2col.
        "c1w": jnp.transpose(params["conv1_w"], (2, 1, 0))
                  .reshape(3 * NUM_MEL_BINS, D_MODEL).astype(wdt),
        "c1b": params["conv1_b"].reshape(1, -1),
        "c2w": jnp.transpose(params["conv2_w"], (2, 1, 0)).astype(wdt),   # (K, C_in, C_out)
        "c2b": params["conv2_b"].reshape(1, -1),
        "ln1_g": stack(lambda l: l["ln1_g"].reshape(1, -1)),
        "ln1_b": stack(lambda l: l["ln1_b"].reshape(1, -1)),
        "q_w": stack(lambda l: per_head_in_out(l["q_w"].T * scale)).astype(wdt),  # (L,H,D,Dh)
        "q_b": stack(lambda l: (l["q_b"] * scale).reshape(H, 1, Dh)),             # (L,H,1,Dh)
        "k_w": stack(lambda l: per_head_in_out(l["k_w"].T)).astype(wdt),
        "v_w": stack(lambda l: per_head_in_out(l["v_w"].T)).astype(wdt),
        "v_b": stack(lambda l: l["v_b"].reshape(H, 1, Dh)),
        "o_w": stack(lambda l: l["o_w"].T.reshape(H, Dh, D_MODEL)).astype(wdt),   # (L,H,Dh,D)
        "o_b": stack(lambda l: l["o_b"].reshape(1, -1)),
        "ln2_g": stack(lambda l: l["ln2_g"].reshape(1, -1)),
        "ln2_b": stack(lambda l: l["ln2_b"].reshape(1, -1)),
        "fc1_w": stack(lambda l: l["fc1_w"].T).astype(wdt),                       # (L,D,FFN)
        "fc1_b": stack(lambda l: l["fc1_b"].reshape(1, -1)),
        "fc2_w": stack(lambda l: l["fc2_w"].T).astype(wdt),                       # (L,FFN,D)
        "fc2_b": stack(lambda l: l["fc2_b"].reshape(1, -1)),
        "lnf_g": params["ln_f_g"].reshape(1, -1),
        "lnf_b": params["ln_f_b"].reshape(1, -1),
    }
    return kp


# ----------------------------- main -----------------------------
if __name__ == "__main__":
    key = jax.random.PRNGKey(0)
    k_param, k_a1, k_a2 = jax.random.split(key, 3)

    params = init_params(k_param)
    kernel_params = prepare_kernel_params(params)
    mel_filters = mel_filter_bank(
        num_frequency_bins=NUM_FREQ_BINS,
        num_mel_bins=NUM_MEL_BINS,
        min_frequency=0.0,
        max_frequency=8000.0,
        sampling_rate=SAMPLING_RATE,
    )

    # audio lengths chosen so each produces an integer number of chunks
    audio1 = 0.1 * jax.random.normal(k_a1, (CHUNK_SIZE * HOP_LENGTH,), dtype=jnp.float32)      # 1 chunk
    audio2 = 0.1 * jax.random.normal(k_a2, (2 * CHUNK_SIZE * HOP_LENGTH,), dtype=jnp.float32)  # 2 chunks

    outputs = voxtral_encoder_forward(kernel_params, mel_filters, [audio1, audio2])
    outputs = [jax.block_until_ready(o) for o in outputs]

    assert outputs[0].shape == (MAX_SOURCE_POSITIONS, D_MODEL)
    assert outputs[1].shape == (2 * MAX_SOURCE_POSITIONS, D_MODEL)
    assert all(bool(jnp.all(jnp.isfinite(o))) for o in outputs)
    print("KERNEL_OK")
</pallas_src>

<mosaic_0001>
module attributes {stable_mosaic.version = 11 : i64} {
  func.func @_mel_log_kernel(%arg0: i32, %arg1: memref<1x32x33xf32, #tpu.memory_space<vmem>>, %arg2: memref<33x16xf32, #tpu.memory_space<vmem>>, %arg3: memref<1x32x16xf32, #tpu.memory_space<vmem>>) attributes {dimension_semantics = [#tpu.dimension_semantics<parallel>], iteration_bounds = array<i64: 2>, scalar_prefetch = 0 : i64, scratch_operands = 0 : i64, tpu.core_type = #tpu.core_type<tc>, window_params = [{transform_indices = @transform_0, window_bounds = array<i64: 1, 32, 33>}, {pipeline_mode = #tpu.pipeline_mode<synchronous>, transform_indices = @transform_1, window_bounds = array<i64: 33, 16>}, {transform_indices = @transform_2, window_bounds = array<i64: 1, 32, 16>}]} {
    %c0 = arith.constant 0 : index
    %c0_0 = arith.constant 0 : index
    %c0_1 = arith.constant 0 : index
    %0 = vector.load %arg1[%c0, %c0_0, %c0_1] : memref<1x32x33xf32, #tpu.memory_space<vmem>>, vector<1x32x33xf32>
    %1 = vector.shape_cast %0 : vector<1x32x33xf32> to vector<32x33xf32>
    %c0_2 = arith.constant 0 : index
    %c0_3 = arith.constant 0 : index
    %2 = vector.load %arg2[%c0_2, %c0_3] : memref<33x16xf32, #tpu.memory_space<vmem>>, vector<33x16xf32>
    %cst = arith.constant dense<0.000000e+00> : vector<32x16xf32>
    %3 = tpu.matmul %1, %2, %cst {dimension_numbers = #tpu.dot_dimension_numbers<[1], [0], [0], [1], [0, 0, 1, 1], [], []>} : vector<32x33xf32>, vector<33x16xf32>, vector<32x16xf32> -> vector<32x16xf32>
    %cst_4 = arith.constant 1.000000e-10 : f32
    %4 = vector.broadcast %cst_4 : f32 to vector<32x16xf32>
    %5 = arith.maximumf %3, %4 : vector<32x16xf32>
    %6 = math.log %5 : vector<32x16xf32>
    %cst_5 = arith.constant 0.434294492 : f32
    %7 = vector.broadcast %cst_5 : f32 to vector<32x16xf32>
    %8 = arith.mulf %6, %7 : vector<32x16xf32>
    %9 = vector.shape_cast %8 : vector<32x16xf32> to vector<1x32x16xf32>
    %cst_6 = arith.constant dense<0xFF800000> : vector<1xf32>
    %10 = vector.multi_reduction <maximumf>, %9, %cst_6 [1, 2] : vector<1x32x16xf32> to vector<1xf32>
    %11 = vector.shape_cast %10 : vector<1xf32> to vector<1x1x1xf32>
    %12 = vector.extract %11[0, 0, 0] : f32 from vector<1x1x1xf32>
    %cst_7 = arith.constant 8.000000e+00 : f32
    %13 = arith.subf %12, %cst_7 : f32
    %14 = vector.broadcast %13 : f32 to vector<32x16xf32>
    %15 = arith.maximumf %8, %14 : vector<32x16xf32>
    %cst_8 = arith.constant 4.000000e+00 : f32
    %16 = vector.broadcast %cst_8 : f32 to vector<32x16xf32>
    %17 = arith.addf %15, %16 : vector<32x16xf32>
    %cst_9 = arith.constant 4.000000e+00 : f32
    %18 = vector.broadcast %cst_9 : f32 to vector<32x16xf32>
    %19 = arith.divf %17, %18 : vector<32x16xf32>
    %c0_10 = arith.constant 0 : index
    %c0_11 = arith.constant 0 : index
    %c0_12 = arith.constant 0 : index
    %20 = vector.load %arg3[%c0_10, %c0_11, %c0_12] : memref<1x32x16xf32, #tpu.memory_space<vmem>>, vector<1x32x16xf32>
    %21 = vector.shape_cast %20 : vector<1x32x16xf32> to vector<32x16xf32>
    %22 = vector.shape_cast %19 : vector<32x16xf32> to vector<1x32x16xf32>
    tpu.vector_store %arg3[%c0_10, %c0_11, %c0_12], %22 {strides = array<i32>} : memref<1x32x16xf32, #tpu.memory_space<vmem>>, vector<1x32x16xf32>,
    return
  }
  func.func @transform_0(%arg0: i32) -> (i32, i32, i32) {
    %c0_i32 = arith.constant 0 : i32
    %c0_i32_0 = arith.constant 0 : i32
    %c0_i32_1 = arith.constant 0 : i32
    return %arg0, %c0_i32, %c0_i32_0 : i32, i32, i32
  }
  func.func @transform_1(%arg0: i32) -> (i32, i32) {
    %c0_i32 = arith.constant 0 : i32
    %c0_i32_0 = arith.constant 0 : i32
    %c0_i32_1 = arith.constant 0 : i32
    return %c0_i32, %c0_i32_0 : i32, i32
  }
  func.func @transform_2(%arg0: i32) -> (i32, i32, i32) {
    %c0_i32 = arith.constant 0 : i32
    %c0_i32_0 = arith.constant 0 : i32
    %c0_i32_1 = arith.constant 0 : i32
    return %arg0, %c0_i32, %c0_i32_0 : i32, i32, i32
  }
}

</mosaic_0001>

<bundles_post_ra>
// kernel: tpu_custom_call.1
= control target key start
LH: loop header
LB: loop body
LE: loop exit
PB: predicated region body
PF: predicated region fallthrough
CT: control target
= control target key end

     0   :  { %7 = vsyncpa [#allocation3], 0  ;;  %s723_s0 = inlined_call_operand.hbm [shape: f32[2,32,33], index: 0, kind: input, shape index: {}]   ;;  %s724_s1 = inlined_call_operand.vmem [shape: f32[33,16], index: 1, kind: input, shape index: {}]   ;;  %s725_s2 = inlined_call_operand.vmem [shape: f32[2,32,16], index: 2, kind: output, shape index: {}]  }
   0x1   :  { %9 = vsyncpa [#allocation3 + $0x1], 0  ;;  %s588_s9 = smov 0   ;;  %s590_s10 = smov 0  }
   0x2   :  { %s592_s11 = smov 0   ;;  %s594_s12 = smov 0  }
   0x3 LB: > { %s607_s13 = sadd.s32 4294967295, %s568_s12   ;;  %s610_s14 = sadd.s32 1, %s568_s12   ;;  %s568_s12 = sphi %s594_s12, %s732_s12   ;;  %s564_s11 = sphi %s592_s11, %s731_s11   ;;  %s560_s10 = sphi %s590_s10, %s730_s10   ;;  %s556_s9 = sphi %s588_s9, %s729_s9  }
   0x4   : > { %s19_s15 = ssub.s32 %s568_s12, %s610_s14  ;;  %s22_s16 = sadd.s32 1, %s564_s11 }
   0x5   : > { %p20_p0 = scmp.eq.s32.totalorder %s19_s15, 0  ;;  %p29_p1 = scmp.ne.s32.totalorder %s564_s11, %s560_s10 }
   0x6   : > { %p30_p2 = scmp.eq.s32.totalorder %s568_s12, 0  ;;  %p35_p3 = scmp.ne.s32.totalorder %s560_s10, %s556_s9 }
   0x7   : > { %s620_s17 = scalar_select %p20_p0, %s564_s11, %s22_s16  }
   0x8   : > { %p31_p4 = por %p30_p2, %p29_p1  ;;  %p36_p5 = scmp.eq.s32.totalorder %s607_s13, 0 }
   0x9   : > { %p461_p6 = scmp.lt.s32.totalorder %s568_s12, 2  ;;  %s109_s19 = sand.u32 1, %s564_s11  }
   0xa   : > { %p624_p7 = por %p36_p5, %p35_p3  ;;  %s397_s20 = sshll.u32 %s109_s19, 5 }
   0xb   : > { %s412_s21 = sshll.u32 %s568_s12, 9  ;;  %s113_s25 = scalar_lea.vmem [#allocation2], %s397_s20 }
   0xc   : > { %s633_s24 = scalar_lea.hbm %s723_s0, %s412_s21  ;;  %s120_s26 = sshll.u32 %s113_s25, 4  ;;  %s635_s26 = int_to_ptr.vmem [resolvable:$true] %s120_s26 }
   0xd   : > { %p637_p8 = pnand %p461_p6, %p31_p4  ;;  %s642_s28 = scalar_lea.sflag [#allocation3], %s109_s19 }
   0xe   : > { %s504_s29 = scalar_lea.hbm %s633_s24, 512  ;;  %s509_s4 = scalar_lea.hbm %s723_s0, 1024 }
   0xf   : > { %p505_p10 = scmp.ne.s32.totalorder %s633_s24, %s504_s29  ;;  %p506_p11 = pneg %p637_p8 }
  0x10   : > { %p510_p0 = scmp.lt.u32.totalorder %s633_s24, %s723_s0  ;;  %p511_p1 = scmp.lt.u32.totalorder %s509_s4, %s504_s29 }
  0x11   : > { %p507_p12 = pnand %p506_p11, %p505_p10  ;;  %p513_p3 = scmp.lt.u32.totalorder %s504_s29, %s633_s24 }
  0x12   : > { %p512_p2 = por %p511_p1, %p510_p0 }
  0x13   : > { %p508_p13 = pneg %p507_p12 }
  0x14   : > { %p514_p4 = por %p513_p3, %p512_p2 }
  0x16   : > { %p515_p5 = pnand %p514_p4, %p508_p13 }
  0x18   : > { %518 = shalt.err (!%p515_p5)
}
  0x19   : > { %s519_s7 = scalar_lea.vmem %s635_s26, 512  ;;  %s570_s8 = smov [#allocation2]  }
  0x1a   : > { %p520_p6 = scmp.ne.s32.totalorder %s635_s26, %s519_s7  ;;  %s524_s9 = sshll.u32 %s570_s8, 4  ;;  %s525_s9 = int_to_ptr.vmem [resolvable:$false] %s524_s9 }
  0x1b   : > { %s526_s15 = scalar_lea.vmem %s525_s9, 1024  ;;  %p527_p9 = scmp.lt.s32.totalorder %s635_s26, %s525_s9 }
  0x1c   : > { %p522_p10 = pnand %p520_p6, %p506_p11  ;;  %p528_p0 = scmp.lt.s32.totalorder %s526_s15, %s519_s7 }
  0x1e   : > { %p523_p12 = pneg %p522_p10  ;;  %p529_p1 = por %p528_p0, %p527_p9 }
  0x20   : > { %p530_p2 = pnand %p529_p1, %p523_p12 }
  0x22   : > { %533 = shalt.err (!%p530_p2)
}
  0x23   : > { %s571_s16 = smov 128   ;;  %s572_s19 = smov 8  }
  0x24   : > { %460 = dma.hbm_to_vmem [thread:$0]  (!%p637_p8), %s633_s24, 512, %s635_s26, %s642_s28, %s571_s16, %s571_s16, %s572_s19  }
  0x25   : > { %p128_p11 = scmp.lt.s32.totalorder %s568_s12, 3  ;;  %p728_p13 = scmp.ge.s32.totalorder %s568_s12, 1 }
  0x27   : > { %p129_p3 = pnand %p728_p13, %p128_p11 }
  0x28   : > { %s134_s20 = sand.u32 (!%p129_p3), 1, %s560_s10  }
  0x29   : > { %132 = sbr.rel (%p129_p3) target bundleno = 514 (0x202), region = 28  ;;  %s401_s21 = sshll.u32 (!%p129_p3), %s134_s20, 5 }
  0x2a   : > { %s135_s22 = scalar_lea.sflag (!%p129_p3), [#allocation3], %s134_s20  ;;  %s138_s23 = scalar_lea.vmem (!%p129_p3), [#allocation2], %s401_s21 }
  0x30   : > { %551 = dma.done.wait (%p624_p7), %s135_s22, 512  }
  0x31   : > { %553 = vsyncadd (%p624_p7), %s135_s22, 4294966784  ;;  %vm173_vm0 = vcmask 269312   ;;  %v168_v0 = vld [vmem:[%s724_s1] sm:$0xff]  ;;  %v169_v1 = vld [vmem:[%s724_s1 + $0x8] sm:$0xff]  ;;  %vm186_vm1 = vcmask 1040384   ;;  %vm291_vm2 = vcmask 130048  }
  0x32   : > { %v170_v2 = vld [vmem:[%s724_s1 + $0x10] sm:$0xff]  ;;  %v439_v3 = vpack.c.bf16 %v169_v1, %v168_v0  ;;  %v171_v4 = vld [vmem:[%s724_s1 + $0x18] sm:$0xff]  ;;  %v164_v5 = vld [vmem:[%s138_s23] sm:$0xff]  ;;  %p159_p7 = scmp.lt.s32.totalorder %s607_s13, 1 }
  0x33   : > { %v443_v6 = vpack.c.bf16 %v171_v4, %v170_v2  ;;  %433 = vmatprep.mubr.msk.f32.mxu0 %vm173_vm0, %v164_v5  ;;  %v166_v7 = vld [vmem:[%s138_s23 + $0x10] sm:$0xff]  ;;  %v172_v8 = vld [vmem:[%s724_s1 + $0x20] sm:$0x1]  ;;  %v165_v9 = vld [vmem:[%s138_s23 + $0x8] sm:$0xff] }
  0x34   : > { %440 = vmatprep.subr.bf16.mxu0 %v439_v3  ;;  %447 = vmatprep.subr.bf16.mxu1 %v439_v3  ;;  %v167_v10 = vld [vmem:[%s138_s23 + $0x18] sm:$0xff]  ;;  %s734_s13 = smov (!%p159_p7, %s607_s13), 1 }
  0x35   : > { %442 = vmatpush3.bf16.msra.mxu0 %v439_v3  ;;  %450 = vmatpush3.bf16.msra.mxu1 %v439_v3  ;;  %s413_s6 = sshll.u32 %s734_s13, 5 }
  0x36   : > { %444 = vmatprep.subr.bf16.mxu0 %v443_v6  ;;  %448 = vmatprep.subr.bf16.mxu1 %v443_v6  ;;  %s163_s9 = scalar_lea.vmem %s725_s2, %s413_s6 }
  0x37   : > { %436 = vmatprep.mubr.msk.f32.mxu1 %vm173_vm0, %v166_v7 }
  0x39   : > { %446 = vmatpush3.bf16.msra.mxu0 %v443_v6  ;;  %451 = vmatpush3.bf16.msra.mxu1 %v443_v6 }
  0x3a   : > { %431 = vmatprep.subr.msk.mxu0 %vm186_vm1, %v172_v8  ;;  %449 = vmatprep.subr.msk.mxu1 %vm186_vm1, %v172_v8 }
  0x3d   : > { %432 = vmatpush3.msk.msra.mxu0 %vm186_vm1, %v172_v8  ;;  %452 = vmatpush3.msk.msra.mxu1 %vm186_vm1, %v172_v8 }
  0x3e   : > { %434 = vmatmul.mubr.msk.f32.vlgmr.msra.gmra.mrb[0].mxu0 %vm173_vm0, %v165_v9  ;;  %437 = vmatmul.mubr.msk.f32.vlgmr.msra.gmra.mrb[0].mxu1 %vm173_vm0, %v167_v10 }
 0x111   : > { %v435_v11 = vpop.f32.mrb[0].mxu0  ;;  %v438_v12 = vpop.f32.mrb[0].mxu1 }
 0x112   : > { %v276_v13 = vmax.f32 %v435_v11, 1e-10  ;;  %v278_v14 = vmax.f32 %v438_v12, 1e-10  ;;  %v256_v15 = vpop.f32.mrb[1].mxu0  ;;  %v266_v16 = vpop.f32.mrb[1].mxu1 }
 0x113   : > { %v275_v17 = vmax.f32 %v256_v15, 1e-10  ;;  %v277_v18 = vmax.f32 %v266_v16, 1e-10 }
 0x114   : > { %496 = vlog2.f32 %v276_v13 }
 0x115   : > { %498 = vlog2.f32 %v278_v14 }
 0x116   : > { %500 = vlog2.f32 %v275_v17 }
 0x117   : > { %502 = vlog2.f32 %v277_v18 }
 0x11e   : > { %v497_v19 = vpop.eup %496 }
 0x11f   : > { %v499_v20 = vpop.eup %498  ;;  %v282_v21 = vmul.f32 0.6931472, %v497_v19 }
 0x120   : > { %v501_v22 = vpop.eup %500  ;;  %v286_v23 = vmul.f32 0.6931472, %v499_v20 }
 0x121   : > { %v503_v24 = vpop.eup %502  ;;  %v288_v25 = vmul.f32 0.4342945, %v282_v21  ;;  %v280_v26 = vmul.f32 0.6931472, %v501_v22 }
 0x122   : > { %v290_v27 = vmul.f32 0.4342945, %v286_v23  ;;  %v284_v28 = vmul.f32 0.6931472, %v503_v24 }
 0x123   : > { %v287_v29 = vmul.f32 0.4342945, %v280_v26  ;;  %v293_v30 = vsel %vm291_vm2, %v288_v25, -inf }
 0x124   : > { %v289_v31 = vmul.f32 0.4342945, %v284_v28  ;;  %v295_v32 = vsel %vm291_vm2, %v290_v27, -inf }
 0x125   : > { %v292_v33 = vsel %vm291_vm2, %v287_v29, -inf }
 0x126   : > { %v294_v34 = vsel %vm291_vm2, %v289_v31, -inf  ;;  %v296_v35 = vmax.f32 %v292_v33, %v293_v30 }
 0x127   : > { %v297_v36 = vmax.f32 %v294_v34, %v295_v32 }
 0x129   : > { %v298_v37 = vmax.f32 %v296_v35, %v297_v36 }
 0x12b   : > { %299 = vmax.xlane.f32.xlu0 %v298_v37 }
 0x1b8   : > { %v300_v38 = vpop.xlane.xlu0 %299 }
 0x1b9   : > { %v301_v39 = vrot.slane %v300_v38, 4 }
 0x1bb   : > { %v302_v40 = vmax.f32 %v300_v38, %v301_v39 }
 0x1bd   : > { %v303_v41 = vrot.slane %v302_v40, 2 }
 0x1bf   : > { %v304_v42 = vmax.f32 %v302_v40, %v303_v41 }
 0x1c1   : > { %v305_v43 = vrot.slane %v304_v42, 1 }
 0x1c3   : > { %v306_v44 = vmax.f32 %v304_v42, %v305_v43 }
 0x1c5   : > { %453 = vpush %v306_v44 }
 0x1f6   : > { %s454_s4 = spop %453 }
 0x1f7   : > { %s409_s5 = sadd.f32 -8.0, %s454_s4 }
 0x1f9   : > { %v309_v45 = vstv %s409_s5 }
 0x1fa   : > { %v310_v46 = vmax.f32 %v287_v29, %v309_v45  ;;  %v311_v47 = vmax.f32 %v288_v25, %v309_v45  ;;  %v312_v48 = vmax.f32 %v289_v31, %v309_v45  ;;  %v313_v49 = vmax.f32 %v290_v27, %v309_v45 }
 0x1fc   : > { %v314_v50 = vadd.f32 4.0, %v310_v46  ;;  %v315_v51 = vadd.f32 4.0, %v311_v47  ;;  %v316_v52 = vadd.f32 4.0, %v312_v48  ;;  %v317_v53 = vadd.f32 4.0, %v313_v49 }
 0x1fe   : > { %v319_v54 = vmul.f32 0.25, %v314_v50  ;;  %v320_v55 = vmul.f32 0.25, %v315_v51  ;;  %v321_v56 = vmul.f32 0.25, %v316_v52  ;;  %v322_v57 = vmul.f32 0.25, %v317_v53 }
 0x200   : > { %323 = vst.msk [vmem:[%s163_s9] sm:$0xff] %vm291_vm2, %v319_v54  ;;  %324 = vst.msk [vmem:[%s163_s9 + $0x8] sm:$0xff] %vm291_vm2, %v320_v55 }
 0x201   : > { %325 = vst.msk [vmem:[%s163_s9 + $0x10] sm:$0xff] %vm291_vm2, %v321_v56  ;;  %326 = vst.msk [vmem:[%s163_s9 + $0x18] sm:$0xff] %vm291_vm2, %v322_v57 }
 0x202 PF: > { %p12_p8 = scmp.ge.s32.totalorder %s610_s14, 4   ;;  %s729_s9 = smov %s560_s10 }
 0x203   : > { %s730_s10 = smov %s564_s11  ;;  %s731_s11 = smov %s620_s17 }
 0x204   : > { %s732_s12 = smov %s610_s14  ;;  %14 = sbr.rel (!%p12_p8) target bundleno = 3 (0x3), region = 68 }
 0x20b   :  { %348 = vsyncpa [#allocation3], 1 }
 0x20c   :  { %350 = vsyncpa [#allocation3 + $0x1], 1 }

</bundles_post_ra>
